<compile_context>
chip_gen: v7x
topology: tpu7x:2x2x1
jax: 0.10.0
libtpu: 0.0.40
codegen_flags: <defaults>
</compile_context>

<pallas_src>
import functools

import jax
import jax.numpy as jnp
from jax.experimental import pallas as pl
from jax.experimental.pallas import tpu as pltpu

HIDDEN_LAYERS = 4
M = 32
N = 4
NUM_LATENCIES = 1  # USE_BUCKETS = False

IN_DIM = N * 9  # 36
# (in, out) dims of every Linear in order: start, 4 hidden, end
LAYER_DIMS = (
    [(IN_DIM, M)]
    + [(M // 2**i, M // 2 ** (i + 1)) for i in range(HIDDEN_LAYERS)]
    + [(M // 2**HIDDEN_LAYERS, NUM_LATENCIES)]
)
NUM_LAYERS = len(LAYER_DIMS)  # 6
LEAKY_SLOPE = 0.01


def _round_up(x, m):
    return (x + m - 1) // m * m


def _cdiv(a, b):
    return (a + b - 1) // b


def mlp_kernel(x_ref, w_ref, b_ref, o_ref, *, pack, ew_dtype):
    """Fused, block-diagonal-packed MLP forward for one tile of packed rows.

    x_ref : (Tp, pack*36)            bf16  (P samples per row, lane-dense)
    w_ref : (6, pack*36, pack*32)    bf16  (block-diagonal, zero-padded)
    b_ref : (6, pack*32)             f32   (zero-padded, per-block tiled)
    o_ref : (Tp, pack*NUM_LATENCIES) f32
    """
    p_hid = pack * M
    n_lat = pack * NUM_LATENCIES

    b_f32 = b_ref[...]                 # tiny, resident
    b_act = b_f32.astype(ew_dtype)

    # layer 0: Linear(36 -> 32 per sample, block-diagonal) + ReLU
    h = jnp.dot(x_ref[...], w_ref[0],
                preferred_element_type=jnp.float32).astype(ew_dtype)
    h = jnp.maximum(h + b_act[0:1, :], 0.0)

    # hidden layers: Linear + LeakyReLU(0.01), each block padded to width 32.
    # Zero-padded weight rows/cols and zero biases keep padded columns at 0.
    for l in range(1, 1 + HIDDEN_LAYERS):
        z = jnp.dot(h.astype(jnp.bfloat16), w_ref[l, :p_hid, :],
                    preferred_element_type=jnp.float32).astype(ew_dtype)
        z = z + b_act[l:l + 1, :]
        h = jnp.maximum(z, LEAKY_SLOPE * z)

    # end layer: Linear(2 -> 1 per sample); block p's output lands on lane p.
    out = jnp.dot(h.astype(jnp.bfloat16),
                  w_ref[NUM_LAYERS - 1, :p_hid, :n_lat],
                  preferred_element_type=jnp.float32)
    out = out + b_f32[NUM_LAYERS - 1:NUM_LAYERS, :n_lat]
    o_ref[...] = out.astype(o_ref.dtype)


def _pack_params(params, pack):
    """Block-diagonally pack all 6 layers into one weight slab + one bias slab."""
    p_in, p_hid = pack * IN_DIM, pack * M
    w_rows, b_rows = [], []
    for l, (w, b) in enumerate(params):
        fi, fo = w.shape
        blk_in = IN_DIM if l == 0 else M
        blk_out = M if l < NUM_LAYERS - 1 else NUM_LATENCIES
        w_blk = jnp.pad(w, ((0, blk_in - fi), (0, blk_out - fo)))
        b_blk = jnp.pad(b.reshape(-1), (0, blk_out - fo))
        w_bd = jax.scipy.linalg.block_diag(*([w_blk] * pack))
        b_bd = jnp.tile(b_blk, pack)
        w_rows.append(jnp.pad(
            w_bd, ((0, p_in - pack * blk_in), (0, p_hid - pack * blk_out))))
        b_rows.append(jnp.pad(b_bd, (0, p_hid - pack * blk_out)))
    w_slab = jnp.stack(w_rows, axis=0).astype(jnp.bfloat16)  # (6, P*36, P*32)
    b_slab = jnp.stack(b_rows, axis=0)                       # (6, P*32) f32
    return w_slab, b_slab


def _default_config():
    """Pick pack factor / element-wise dtype from the TPU generation."""
    pack, ew_bf16 = 8, True  # v6e / v7x: 256-wide MXU, bf16 VPU
    try:
        kind = jax.devices()[0].device_kind.lower()
    except Exception:
        return pack, ew_bf16
    if any(v in kind for v in ("v2", "v3", "v4", "v5")):
        pack, ew_bf16 = 4, False  # 128-wide MXU, no bf16 VPU
    return pack, ew_bf16


@functools.partial(jax.jit, static_argnames=("pack", "batch_tile", "ew_bf16"))
def _forward(x, params, *, pack, batch_tile, ew_bf16):
    B, D = x.shape
    assert D == IN_DIM

    p_in = pack * IN_DIM
    p_hid = pack * M
    n_lat = pack * NUM_LATENCIES

    # --- batch tiling: pad only to pack*16 alignment and rebalance the tile
    # across grid steps (no round-up to a full batch_tile multiple). ---
    row_align = 16                         # bf16 sublane packing of x rows
    b_align = pack * row_align
    B_al = _round_up(B, b_align)
    rows = B_al // pack                    # packed rows, multiple of 16

    max_rows_per_tile = max(row_align, _round_up(batch_tile, b_align) // pack)
    n_steps = _cdiv(rows, max_rows_per_tile)
    if rows >= 2 * row_align:              # let v7x's two TensorCores both work
        n_steps = max(n_steps, 2)
    tile_rows = _round_up(_cdiv(rows, n_steps), row_align)
    rows_pad = n_steps * tile_rows
    B_pad = rows_pad * pack

    # pad + P-pack + bf16 cast in one fused relayout op
    x_p = jnp.pad(x, ((0, B_pad - B), (0, 0))).astype(jnp.bfloat16)
    x_p = x_p.reshape(rows_pad, p_in)

    w_slab, b_slab = _pack_params(params, pack)
    ew_dtype = jnp.bfloat16 if ew_bf16 else jnp.float32

    flops = 2 * rows_pad * (p_in * p_hid
                            + HIDDEN_LAYERS * p_hid * p_hid
                            + p_hid * n_lat)
    bytes_accessed = (rows_pad * p_in * 2               # x (bf16)
                      + NUM_LAYERS * p_in * p_hid * 2   # weight slab (bf16)
                      + NUM_LAYERS * p_hid * 4          # bias slab (f32)
                      + rows_pad * n_lat * 4)           # output (f32)

    out = pl.pallas_call(
        functools.partial(mlp_kernel, pack=pack, ew_dtype=ew_dtype),
        out_shape=jax.ShapeDtypeStruct((rows_pad, n_lat), jnp.float32),
        grid_spec=pltpu.PrefetchScalarGridSpec(
            num_scalar_prefetch=0,
            grid=(n_steps,),
            in_specs=[
                pl.BlockSpec((tile_rows, p_in), lambda i: (i, 0)),
                pl.BlockSpec((NUM_LAYERS, p_in, p_hid), lambda i: (0, 0, 0)),
                pl.BlockSpec((NUM_LAYERS, p_hid), lambda i: (0, 0)),
            ],
            out_specs=pl.BlockSpec((tile_rows, n_lat), lambda i: (i, 0)),
        ),
        compiler_params=pltpu.CompilerParams(
            dimension_semantics=("parallel",),
        ),
        cost_estimate=pl.CostEstimate(
            flops=flops, transcendentals=0, bytes_accessed=bytes_accessed),
    )(x_p, w_slab, b_slab)

    # packed rows are in row-major sample order -> flatten and drop padding
    return out.reshape(rows_pad * pack, NUM_LATENCIES)[:B]


def neural_network_forward(x, params, *, pack=None, batch_tile=4096,
                           ew_bf16=None):
    """x: (B, 36) f32; params: list of 6 (W, b) with W (in, out), b (1, out)."""
    d_pack, d_ew = _default_config()
    if pack is None:
        pack = d_pack
    if ew_bf16 is None:
        ew_bf16 = d_ew
    return _forward(x, params, pack=pack, batch_tile=batch_tile,
                    ew_bf16=ew_bf16)


def init_params(key):
    """Deterministic init matching torch.nn.Linear's U(-1/sqrt(fan_in), ...)."""
    params = []
    for (fan_in, fan_out) in LAYER_DIMS:
        key, kw, kb = jax.random.split(key, 3)
        bound = 1.0 / jnp.sqrt(jnp.float32(fan_in))
        w = jax.random.uniform(kw, (fan_in, fan_out), jnp.float32, -bound, bound)
        b = jax.random.uniform(kb, (1, fan_out), jnp.float32, -bound, bound)
        params.append((w, b))
    return params


def reference_forward(x, params):
    """Plain-JAX (f32) reference of the PyTorch forward pass."""
    h = jnp.maximum(x @ params[0][0] + params[0][1], 0.0)
    for i in range(1, 1 + HIDDEN_LAYERS):
        z = h @ params[i][0] + params[i][1]
        h = jnp.where(z >= 0.0, z, LEAKY_SLOPE * z)
    return h @ params[-1][0] + params[-1][1]


if __name__ == "__main__":
    key = jax.random.PRNGKey(0)
    key, kx = jax.random.split(key)
    params = init_params(key)

    # B=16 (small), B=10 (heavy pad path), B=300 (multi-step grid path).
    for B in (16, 10, 300):
        kx, kb = jax.random.split(kx)
        x = jax.random.normal(kb, (B, IN_DIM), jnp.float32)

        out = jax.block_until_ready(neural_network_forward(x, params))
        ref = reference_forward(x, params)

        assert out.shape == (B, NUM_LATENCIES)
        # bf16 MXU inputs (and bf16 element-wise on v6e/v7x) vs f32 reference.
        assert jnp.allclose(out, ref, atol=5e-2, rtol=5e-2), float(
            jnp.max(jnp.abs(out - ref))
        )

    print("KERNEL_OK")
</pallas_src>

<mosaic_0001>
module attributes {stable_mosaic.version = 11 : i64} {
  func.func @mlp_kernel(%arg0: i32, %arg1: memref<16x288xbf16, #tpu.memory_space<vmem>>, %arg2: memref<6x288x256xbf16, #tpu.memory_space<vmem>>, %arg3: memref<6x256xf32, #tpu.memory_space<vmem>>, %arg4: memref<16x8xf32, #tpu.memory_space<vmem>>) attributes {dimension_semantics = [#tpu.dimension_semantics<parallel>], iteration_bounds = array<i64: 1>, scalar_prefetch = 0 : i64, scratch_operands = 0 : i64, tpu.core_type = #tpu.core_type<tc>, window_params = [{transform_indices = @transform_0, window_bounds = array<i64: 16, 288>}, {pipeline_mode = #tpu.pipeline_mode<synchronous>, transform_indices = @transform_1, window_bounds = array<i64: 6, 288, 256>}, {pipeline_mode = #tpu.pipeline_mode<synchronous>, transform_indices = @transform_2, window_bounds = array<i64: 6, 256>}, {transform_indices = @transform_3, window_bounds = array<i64: 16, 8>}]} {
    %c0 = arith.constant 0 : index
    %c0_0 = arith.constant 0 : index
    %0 = vector.load %arg3[%c0, %c0_0] : memref<6x256xf32, #tpu.memory_space<vmem>>, vector<6x256xf32>
    %1 = arith.truncf %0 : vector<6x256xf32> to vector<6x256xbf16>
    %c0_1 = arith.constant 0 : index
    %c0_2 = arith.constant 0 : index
    %2 = vector.load %arg1[%c0_1, %c0_2] : memref<16x288xbf16, #tpu.memory_space<vmem>>, vector<16x288xbf16>
    %c0_3 = arith.constant 0 : index
    %c0_4 = arith.constant 0 : index
    %c0_5 = arith.constant 0 : index
    %3 = vector.load %arg2[%c0_3, %c0_4, %c0_5] : memref<6x288x256xbf16, #tpu.memory_space<vmem>>, vector<1x288x256xbf16>
    %4 = vector.shape_cast %3 : vector<1x288x256xbf16> to vector<288x256xbf16>
    %cst = arith.constant dense<0.000000e+00> : vector<16x256xf32>
    %5 = tpu.matmul %2, %4, %cst {dimension_numbers = #tpu.dot_dimension_numbers<[1], [0], [0], [1], [0, 0, 1, 1], [], []>} : vector<16x288xbf16>, vector<288x256xbf16>, vector<16x256xf32> -> vector<16x256xf32>
    %6 = arith.truncf %5 : vector<16x256xf32> to vector<16x256xbf16>
    %7 = vector.extract_strided_slice %1 {offsets = [0, 0], sizes = [1, 256], strides = [1, 1]} : vector<6x256xbf16> to vector<1x256xbf16>
    %8 = vector.broadcast %7 : vector<1x256xbf16> to vector<16x256xbf16>
    %9 = arith.addf %6, %8 : vector<16x256xbf16>
    %cst_6 = arith.constant 0.000000e+00 : bf16
    %10 = vector.broadcast %cst_6 : bf16 to vector<16x256xbf16>
    %11 = arith.maximumf %9, %10 : vector<16x256xbf16>
    %c1 = arith.constant 1 : index
    %c0_7 = arith.constant 0 : index
    %c0_8 = arith.constant 0 : index
    %12 = vector.load %arg2[%c1, %c0_7, %c0_8] : memref<6x288x256xbf16, #tpu.memory_space<vmem>>, vector<1x256x256xbf16>
    %13 = vector.shape_cast %12 : vector<1x256x256xbf16> to vector<256x256xbf16>
    %cst_9 = arith.constant dense<0.000000e+00> : vector<16x256xf32>
    %14 = tpu.matmul %11, %13, %cst_9 {dimension_numbers = #tpu.dot_dimension_numbers<[1], [0], [0], [1], [0, 0, 1, 1], [], []>} : vector<16x256xbf16>, vector<256x256xbf16>, vector<16x256xf32> -> vector<16x256xf32>
    %15 = arith.truncf %14 : vector<16x256xf32> to vector<16x256xbf16>
    %16 = vector.extract_strided_slice %1 {offsets = [1, 0], sizes = [1, 256], strides = [1, 1]} : vector<6x256xbf16> to vector<1x256xbf16>
    %17 = vector.broadcast %16 : vector<1x256xbf16> to vector<16x256xbf16>
    %18 = arith.addf %15, %17 : vector<16x256xbf16>
    %cst_10 = arith.constant 1.000980e-02 : bf16
    %19 = vector.broadcast %cst_10 : bf16 to vector<16x256xbf16>
    %20 = arith.mulf %19, %18 : vector<16x256xbf16>
    %21 = arith.maximumf %18, %20 : vector<16x256xbf16>
    %c2 = arith.constant 2 : index
    %c0_11 = arith.constant 0 : index
    %c0_12 = arith.constant 0 : index
    %22 = vector.load %arg2[%c2, %c0_11, %c0_12] : memref<6x288x256xbf16, #tpu.memory_space<vmem>>, vector<1x256x256xbf16>
    %23 = vector.shape_cast %22 : vector<1x256x256xbf16> to vector<256x256xbf16>
    %cst_13 = arith.constant dense<0.000000e+00> : vector<16x256xf32>
    %24 = tpu.matmul %21, %23, %cst_13 {dimension_numbers = #tpu.dot_dimension_numbers<[1], [0], [0], [1], [0, 0, 1, 1], [], []>} : vector<16x256xbf16>, vector<256x256xbf16>, vector<16x256xf32> -> vector<16x256xf32>
    %25 = arith.truncf %24 : vector<16x256xf32> to vector<16x256xbf16>
    %26 = vector.extract_strided_slice %1 {offsets = [2, 0], sizes = [1, 256], strides = [1, 1]} : vector<6x256xbf16> to vector<1x256xbf16>
    %27 = vector.broadcast %26 : vector<1x256xbf16> to vector<16x256xbf16>
    %28 = arith.addf %25, %27 : vector<16x256xbf16>
    %cst_14 = arith.constant 1.000980e-02 : bf16
    %29 = vector.broadcast %cst_14 : bf16 to vector<16x256xbf16>
    %30 = arith.mulf %29, %28 : vector<16x256xbf16>
    %31 = arith.maximumf %28, %30 : vector<16x256xbf16>
    %c3 = arith.constant 3 : index
    %c0_15 = arith.constant 0 : index
    %c0_16 = arith.constant 0 : index
    %32 = vector.load %arg2[%c3, %c0_15, %c0_16] : memref<6x288x256xbf16, #tpu.memory_space<vmem>>, vector<1x256x256xbf16>
    %33 = vector.shape_cast %32 : vector<1x256x256xbf16> to vector<256x256xbf16>
    %cst_17 = arith.constant dense<0.000000e+00> : vector<16x256xf32>
    %34 = tpu.matmul %31, %33, %cst_17 {dimension_numbers = #tpu.dot_dimension_numbers<[1], [0], [0], [1], [0, 0, 1, 1], [], []>} : vector<16x256xbf16>, vector<256x256xbf16>, vector<16x256xf32> -> vector<16x256xf32>
    %35 = arith.truncf %34 : vector<16x256xf32> to vector<16x256xbf16>
    %36 = vector.extract_strided_slice %1 {offsets = [3, 0], sizes = [1, 256], strides = [1, 1]} : vector<6x256xbf16> to vector<1x256xbf16>
    %37 = vector.broadcast %36 : vector<1x256xbf16> to vector<16x256xbf16>
    %38 = arith.addf %35, %37 : vector<16x256xbf16>
    %cst_18 = arith.constant 1.000980e-02 : bf16
    %39 = vector.broadcast %cst_18 : bf16 to vector<16x256xbf16>
    %40 = arith.mulf %39, %38 : vector<16x256xbf16>
    %41 = arith.maximumf %38, %40 : vector<16x256xbf16>
    %c4 = arith.constant 4 : index
    %c0_19 = arith.constant 0 : index
    %c0_20 = arith.constant 0 : index
    %42 = vector.load %arg2[%c4, %c0_19, %c0_20] : memref<6x288x256xbf16, #tpu.memory_space<vmem>>, vector<1x256x256xbf16>
    %43 = vector.shape_cast %42 : vector<1x256x256xbf16> to vector<256x256xbf16>
    %cst_21 = arith.constant dense<0.000000e+00> : vector<16x256xf32>
    %44 = tpu.matmul %41, %43, %cst_21 {dimension_numbers = #tpu.dot_dimension_numbers<[1], [0], [0], [1], [0, 0, 1, 1], [], []>} : vector<16x256xbf16>, vector<256x256xbf16>, vector<16x256xf32> -> vector<16x256xf32>
    %45 = arith.truncf %44 : vector<16x256xf32> to vector<16x256xbf16>
    %46 = vector.extract_strided_slice %1 {offsets = [4, 0], sizes = [1, 256], strides = [1, 1]} : vector<6x256xbf16> to vector<1x256xbf16>
    %47 = vector.broadcast %46 : vector<1x256xbf16> to vector<16x256xbf16>
    %48 = arith.addf %45, %47 : vector<16x256xbf16>
    %cst_22 = arith.constant 1.000980e-02 : bf16
    %49 = vector.broadcast %cst_22 : bf16 to vector<16x256xbf16>
    %50 = arith.mulf %49, %48 : vector<16x256xbf16>
    %51 = arith.maximumf %48, %50 : vector<16x256xbf16>
    %c5 = arith.constant 5 : index
    %c0_23 = arith.constant 0 : index
    %c0_24 = arith.constant 0 : index
    %52 = vector.load %arg2[%c5, %c0_23, %c0_24] : memref<6x288x256xbf16, #tpu.memory_space<vmem>>, vector<1x256x8xbf16>
    %53 = vector.shape_cast %52 : vector<1x256x8xbf16> to vector<256x8xbf16>
    %cst_25 = arith.constant dense<0.000000e+00> : vector<16x8xf32>
    %54 = tpu.matmul %51, %53, %cst_25 {dimension_numbers = #tpu.dot_dimension_numbers<[1], [0], [0], [1], [0, 0, 1, 1], [], []>} : vector<16x256xbf16>, vector<256x8xbf16>, vector<16x8xf32> -> vector<16x8xf32>
    %55 = vector.extract_strided_slice %0 {offsets = [5, 0], sizes = [1, 8], strides = [1, 1]} : vector<6x256xf32> to vector<1x8xf32>
    %56 = vector.broadcast %55 : vector<1x8xf32> to vector<16x8xf32>
    %57 = arith.addf %54, %56 : vector<16x8xf32>
    %c0_26 = arith.constant 0 : index
    %c0_27 = arith.constant 0 : index
    %58 = vector.load %arg4[%c0_26, %c0_27] : memref<16x8xf32, #tpu.memory_space<vmem>>, vector<16x8xf32>
    tpu.vector_store %arg4[%c0_26, %c0_27], %57 {strides = array<i32>} : memref<16x8xf32, #tpu.memory_space<vmem>>, vector<16x8xf32>,
    return
  }
  func.func @transform_0(%arg0: i32) -> (i32, i32) {
    %c0_i32 = arith.constant 0 : i32
    %c0_i32_0 = arith.constant 0 : i32
    return %arg0, %c0_i32 : i32, i32
  }
  func.func @transform_1(%arg0: i32) -> (i32, i32, i32) {
    %c0_i32 = arith.constant 0 : i32
    %c0_i32_0 = arith.constant 0 : i32
    %c0_i32_1 = arith.constant 0 : i32
    %c0_i32_2 = arith.constant 0 : i32
    return %c0_i32, %c0_i32_0, %c0_i32_1 : i32, i32, i32
  }
  func.func @transform_2(%arg0: i32) -> (i32, i32) {
    %c0_i32 = arith.constant 0 : i32
    %c0_i32_0 = arith.constant 0 : i32
    %c0_i32_1 = arith.constant 0 : i32
    return %c0_i32, %c0_i32_0 : i32, i32
  }
  func.func @transform_3(%arg0: i32) -> (i32, i32) {
    %c0_i32 = arith.constant 0 : i32
    %c0_i32_0 = arith.constant 0 : i32
    return %arg0, %c0_i32 : i32, i32
  }
}

</mosaic_0001>

<bundles_post_ra>
// kernel: tile.38
= control target key start
LH: loop header
LB: loop body
LE: loop exit
PB: predicated region body
PF: predicated region fallthrough
CT: control target
= control target key end

     0   :  { %s22_s0 = inlined_call_operand.vmem [shape: f32[32], index: 0, kind: input, shape index: {}]   ;;  %s23_s1 = inlined_call_operand.vmem [shape: f32[8,32], index: 1, kind: output, shape index: {}]  }
   0x1   :  { %v4_v0 = vld [vmem:[%s22_s0] ss:$0 sm:$0xff] }
   0x2   :  { %5 = vst [vmem:[%s23_s1] sm:$0xff] %v4_v0 }

// kernel: _forward.1
= control target key start
LH: loop header
LB: loop body
LE: loop exit
PB: predicated region body
PF: predicated region fallthrough
CT: control target
= control target key end

     0   :  { %v2197_v61 = vmov 0   ;;  %vm255_vm0 = vcmask 261120   ;;  %vm1553_vm1 = vcmask 64512   ;;  %s2824_s1 = inlined_call_operand.vmem [shape: bf16[6,288,256], index: 1, kind: input, shape index: {}]   ;;  %s2825_s0 = inlined_call_operand.vmem [shape: bf16[16,288], index: 0, kind: input, shape index: {}]   ;;  %s2826_s2 = inlined_call_operand.vmem [shape: f32[6,256], index: 2, kind: input, shape index: {}]   ;;  %s2827_s3 = inlined_call_operand.vmem [shape: f32[16,8], index: 3, kind: output, shape index: {}]  }
   0x1   :  { %v1931_v0 = vld [vmem:[%s2824_s1 + $0x4] ss:$8 sps:$4 sm:$0xff]   ;;  %v1933_v1 = vld [vmem:[%s2824_s1] ss:$8 sps:$4 sm:$0xff]   ;;  %v1934_v2 = vld [vmem:[%s2824_s1 + $0x14] ss:$8 sps:$4 sm:$0xff]  }
   0x2   :  { %259 = vmatprep.subr.bf16.mxu0 %v1931_v0  ;;  %v1936_v3 = vld [vmem:[%s2824_s1 + $0x10] ss:$8 sps:$4 sm:$0xff]   ;;  %v1937_v4 = vld [vmem:[%s2824_s1 + $0x24] ss:$8 sps:$4 sm:$0xff]   ;;  %v1939_v5 = vld [vmem:[%s2824_s1 + $0x20] ss:$8 sps:$4 sm:$0xff]  }
   0x3   :  { %260 = vmatpush1.bf16.msra.mxu0 %v1933_v1  ;;  %v1940_v6 = vld [vmem:[%s2824_s1 + $0x34] ss:$8 sps:$4 sm:$0xff]   ;;  %v1942_v7 = vld [vmem:[%s2824_s1 + $0x30] ss:$8 sps:$4 sm:$0xff]   ;;  %v1943_v8 = vld [vmem:[%s2824_s1 + $0x44] ss:$8 sps:$4 sm:$0xff]  }
   0x4   :  { %261 = vmatprep.subr.bf16.mxu0 %v1934_v2  ;;  %v1945_v9 = vld [vmem:[%s2824_s1 + $0x40] ss:$8 sps:$4 sm:$0xff]   ;;  %v1946_v10 = vld [vmem:[%s2824_s1 + $0x54] ss:$8 sps:$4 sm:$0xff]   ;;  %v1948_v11 = vld [vmem:[%s2824_s1 + $0x50] ss:$8 sps:$4 sm:$0xff]  }
   0x5   :  { %v1949_v12 = vld [vmem:[%s2824_s1 + $0x64] ss:$8 sps:$4 sm:$0xff]   ;;  %v1951_v13 = vld [vmem:[%s2824_s1 + $0x60] ss:$8 sps:$4 sm:$0xff]   ;;  %v1952_v15 = vld [vmem:[%s2824_s1 + $0x74] ss:$8 sps:$4 sm:$0xff]  }
   0x6   :  { %v1981_v14 = vld [vmem:[%s2825_s0 + $0x4] ss:$12 sps:$4 sm:$0xff]   ;;  %v1991_v18 = vld [vmem:[%s2824_s1 + $0x120] ss:$8 sps:$4 sm:$0xff]   ;;  %v1992_v20 = vld [vmem:[%s2824_s1 + $0x134] ss:$8 sps:$4 sm:$0xff]  }
   0x7   :  { %262 = vmatpush1.bf16.msra.mxu0 %v1936_v3  ;;  %291 = vmatprep.mubr.bf16.mxu0 %v1981_v14  ;;  %v1954_v16 = vld [vmem:[%s2824_s1 + $0x70] ss:$8 sps:$4 sm:$0xff]   ;;  %v1989_v17 = vld [vmem:[%s2824_s1 + $0x124] ss:$8 sps:$4 sm:$0xff]   ;;  %v1957_v22 = vld [vmem:[%s2824_s1 + $0x80] ss:$8 sps:$4 sm:$0xff]  }
   0x8   :  { %263 = vmatprep.subr.bf16.mxu0 %v1937_v4  ;;  %v1955_v19 = vld [vmem:[%s2824_s1 + $0x84] ss:$8 sps:$4 sm:$0xff]   ;;  %558 = vmatprep.subr.bf16.mxu1 %v1989_v17  ;;  %v1994_v21 = vld [vmem:[%s2824_s1 + $0x130] ss:$8 sps:$4 sm:$0xff]   ;;  %v1958_v24 = vld [vmem:[%s2824_s1 + $0x94] ss:$8 sps:$4 sm:$0xff]  }
   0x9   :  { %559 = vmatpush1.bf16.msra.mxu1 %v1991_v18  ;;  %v1995_v23 = vld [vmem:[%s2824_s1 + $0x144] ss:$8 sps:$4 sm:$0xff]   ;;  %v1997_v25 = vld [vmem:[%s2824_s1 + $0x140] ss:$8 sps:$4 sm:$0xff]   ;;  %v1960_v26 = vld [vmem:[%s2824_s1 + $0x90] ss:$8 sps:$4 sm:$0xff]  }
   0xa   :  { %560 = vmatprep.subr.bf16.mxu1 %v1992_v20  ;;  %v1998_v27 = vld [vmem:[%s2824_s1 + $0x154] ss:$8 sps:$4 sm:$0xff]   ;;  %v1961_v28 = vld [vmem:[%s2824_s1 + $0xa4] ss:$8 sps:$4 sm:$0xff]   ;;  %v2000_v29 = vld [vmem:[%s2824_s1 + $0x150] ss:$8 sps:$4 sm:$0xff]  }
   0xb   :  { %264 = vmatpush1.bf16.msra.mxu0 %v1939_v5  ;;  %v1963_v30 = vld [vmem:[%s2824_s1 + $0xa0] ss:$8 sps:$4 sm:$0xff]   ;;  %v2001_v31 = vld [vmem:[%s2824_s1 + $0x164] ss:$8 sps:$4 sm:$0xff]   ;;  %v1964_v32 = vld [vmem:[%s2824_s1 + $0xb4] ss:$8 sps:$4 sm:$0xff]  }
   0xc   :  { %265 = vmatprep.subr.bf16.mxu0 %v1940_v6  ;;  %v1966_v33 = vld [vmem:[%s2824_s1 + $0xb0] ss:$8 sps:$4 sm:$0xff]   ;;  %v2003_v34 = vld [vmem:[%s2824_s1 + $0x160] ss:$8 sps:$4 sm:$0xff]   ;;  %v1967_v35 = vld [vmem:[%s2824_s1 + $0xc4] ss:$8 sps:$4 sm:$0xff]  }
   0xd   :  { %561 = vmatpush1.bf16.msra.mxu1 %v1994_v21  ;;  %v2004_v36 = vld [vmem:[%s2824_s1 + $0x174] ss:$8 sps:$4 sm:$0xff]   ;;  %v2006_v37 = vld [vmem:[%s2824_s1 + $0x170] ss:$8 sps:$4 sm:$0xff]   ;;  %v1969_v38 = vld [vmem:[%s2824_s1 + $0xc0] ss:$8 sps:$4 sm:$0xff]  }
   0xe   :  { %562 = vmatprep.subr.bf16.mxu1 %v1995_v23  ;;  %v2007_v39 = vld [vmem:[%s2824_s1 + $0x184] ss:$8 sps:$4 sm:$0xff]   ;;  %v1970_v40 = vld [vmem:[%s2824_s1 + $0xd4] ss:$8 sps:$4 sm:$0xff]   ;;  %v2009_v41 = vld [vmem:[%s2824_s1 + $0x180] ss:$8 sps:$4 sm:$0xff]  }
   0xf   :  { %266 = vmatpush1.bf16.msra.mxu0 %v1942_v7  ;;  %v1972_v42 = vld [vmem:[%s2824_s1 + $0xd0] ss:$8 sps:$4 sm:$0xff]   ;;  %v2010_v43 = vld [vmem:[%s2824_s1 + $0x194] ss:$8 sps:$4 sm:$0xff]   ;;  %v1973_v44 = vld [vmem:[%s2824_s1 + $0xe4] ss:$8 sps:$4 sm:$0xff]  }
  0x10   :  { %267 = vmatprep.subr.bf16.mxu0 %v1943_v8  ;;  %v2012_v45 = vld [vmem:[%s2824_s1 + $0x190] ss:$8 sps:$4 sm:$0xff]   ;;  %v1975_v46 = vld [vmem:[%s2824_s1 + $0xe0] ss:$8 sps:$4 sm:$0xff]   ;;  %v2013_v47 = vld [vmem:[%s2824_s1 + $0x1a4] ss:$8 sps:$4 sm:$0xff]  }
  0x11   :  { %563 = vmatpush1.bf16.msra.mxu1 %v1997_v25  ;;  %v1976_v48 = vld [vmem:[%s2824_s1 + $0xf4] ss:$8 sps:$4 sm:$0xff]   ;;  %v2015_v49 = vld [vmem:[%s2824_s1 + $0x1a0] ss:$8 sps:$4 sm:$0xff]   ;;  %v1978_v50 = vld [vmem:[%s2824_s1 + $0xf0] ss:$8 sps:$4 sm:$0xff]  }
  0x12   :  { %564 = vmatprep.subr.bf16.mxu1 %v1998_v27  ;;  %v2016_v51 = vld [vmem:[%s2824_s1 + $0x1b4] ss:$8 sps:$4 sm:$0xff]   ;;  %v1985_v52 = vld [vmem:[%s2824_s1 + $0x104] ss:$8 sps:$4 sm:$0xff]   ;;  %v2018_v54 = vld [vmem:[%s2824_s1 + $0x1b0] ss:$8 sps:$4 sm:$0xff]  }
  0x13   :  { %268 = vmatpush1.bf16.msra.mxu0 %v1945_v9  ;;  %v1979_v53 = vld [vmem:[%s2825_s0] ss:$12 sps:$4 sm:$0xff]   ;;  %v1988_v56 = vld [vmem:[%s2824_s1 + $0x114] ss:$8 sps:$4 sm:$0xff]   ;;  %v1986_v59 = vld [vmem:[%s2824_s1 + $0x110] ss:$8 sps:$4 sm:$0xff]   ;;  %v350_v9 = vlaneseq }
  0x14   :  { %269 = vmatprep.subr.bf16.mxu0 %v1946_v10  ;;  %v1983_v55 = vld [vmem:[%s2824_s1 + $0x100] ss:$8 sps:$4 sm:$0xff]   ;;  %v2019_v57 = vld [vmem:[%s2824_s1 + $0x1c4] ss:$8 sps:$4 sm:$0xff]   ;;  %v2022_v60 = vld [vmem:[%s2824_s1 + $0x1d4] ss:$8 sps:$4 sm:$0xff]  }
  0x15   :  { %565 = vmatpush1.bf16.msra.mxu1 %v2000_v29  ;;  %v2021_v58 = vld [vmem:[%s2824_s1 + $0x1c0] ss:$8 sps:$4 sm:$0xff]   ;;  %v2024_v62 = vld [vmem:[%s2824_s1 + $0x1d0] ss:$8 sps:$4 sm:$0xff]   ;;  %v2025_v63 = vld [vmem:[%s2824_s1 + $0x1e4] ss:$8 sps:$4 sm:$0xff]  }
  0x16   :  { %566 = vmatprep.subr.bf16.mxu1 %v2001_v31  ;;  %v1982_v0 = vld [vmem:[%s2825_s0 + $0x8] ss:$12 sps:$4 sm:$0xff]   ;;  %v2030_v3 = vld [vmem:[%s2824_s1 + $0x1f0] ss:$8 sps:$4 sm:$0xff]   ;;  %v2031_v4 = vld [vmem:[%s2824_s1 + $0x204] ss:$8 sps:$4 sm:$0xff]  }
  0x17   :  { %270 = vmatpush1.bf16.msra.mxu0 %v1948_v11  ;;  %v2027_v1 = vld [vmem:[%s2824_s1 + $0x1e0] ss:$8 sps:$4 sm:$0xff]   ;;  %v2028_v2 = vld [vmem:[%s2824_s1 + $0x1f4] ss:$8 sps:$4 sm:$0xff]   ;;  %v2036_v7 = vld [vmem:[%s2824_s1 + $0x210] ss:$8 sps:$4 sm:$0xff]  }
  0x18   :  { %271 = vmatprep.subr.bf16.mxu0 %v1949_v12  ;;  %v2033_v5 = vld [vmem:[%s2824_s1 + $0x200] ss:$8 sps:$4 sm:$0xff]   ;;  %v2034_v6 = vld [vmem:[%s2824_s1 + $0x214] ss:$8 sps:$4 sm:$0xff]   ;;  %v2039_v8 = vld [vmem:[%s2824_s1 + $0x244] ss:$8 sps:$4 sm:$0xff]  }
  0x19   :  { %567 = vmatpush1.bf16.msra.mxu1 %v2003_v34  ;;  %v2437_v10 = vld [vmem:[%s2826_s2] sm:$0x3f]  ;;  %v17_v11 = vld [vmem:[%s2826_s2 + $0x8] sm:$0x3f]  ;;  %v2042_v31 = vld [vmem:[%s2824_s1 + $0x254] ss:$8 sps:$4 sm:$0xff]  }
  0x1a   :  { %568 = vmatprep.subr.bf16.mxu1 %v2004_v36  ;;  %v2444_v12 = vpack.c.bf16 %v2437_v10, %v2437_v10  ;;  %v2448_v14 = vpack.c.bf16 %v17_v11, %v17_v11  ;;  %v2037_v29 = vld [vmem:[%s2824_s1 + $0x240] ss:$8 sps:$4 sm:$0xff]   ;;  %v2046_v36 = vld [vmem:[%s2824_s1 + $0x270] ss:$8 sps:$4 sm:$0xff]  }
  0x1b   :  { %272 = vmatpush1.bf16.msra.mxu0 %v1951_v13  ;;  %v2446_v13 = vshrl.u32 %v350_v9, 7  ;;  %v2043_v34 = vld [vmem:[%s2824_s1 + $0x260] ss:$8 sps:$4 sm:$0xff]   ;;  %v2105_v9 = vld [vmem:[%s2824_s1 + $0x3c4] ss:$8 sps:$4 sm:$0xff]  }
  0x1c   :  { %273 = vmatprep.subr.bf16.mxu0 %v1952_v15  ;;  %v2452_v15 = vpack.i.b16 %v2444_v12, %v2444_v12  ;;  %v2459_v17 = vpack.i.b16 %v2448_v14, %v2448_v14  ;;  %v2103_v11 = vld [vmem:[%s2824_s1 + $0x3c0] ss:$8 sps:$4 sm:$0xff]  }
  0x1d   :  { %569 = vmatpush1.bf16.msra.mxu1 %v2006_v37  ;;  %v2051_v37 = vld [vmem:[%s2824_s1 + $0x284] ss:$8 sps:$4 sm:$0xff]  }
  0x1e   :  { %570 = vmatprep.subr.bf16.mxu1 %v2007_v39  ;;  %v2054_v39 = vld [vmem:[%s2824_s1 + $0x294] ss:$8 sps:$4 sm:$0xff]  }
  0x1f   :  { %274 = vmatpush1.bf16.msra.mxu0 %v1954_v16  ;;  %v2455_v16 = vsub.s32 0, %v2446_v13 }
  0x20   :  { %275 = vmatprep.subr.bf16.mxu0 %v1955_v19 }
  0x21   :  { %571 = vmatpush1.bf16.msra.mxu1 %v2009_v41  ;;  %v353_v20 = vrot.slane %v2452_v15, %v2455_v16  ;;  %v2057_v41 = vld [vmem:[%s2824_s1 + $0x2a4] ss:$8 sps:$4 sm:$0xff]  }
  0x22   :  { %572 = vmatprep.subr.bf16.mxu1 %v2010_v43  ;;  %v2060_v43 = vld [vmem:[%s2824_s1 + $0x2b4] ss:$8 sps:$4 sm:$0xff]  }
  0x23   :  { %276 = vmatpush1.bf16.msra.mxu0 %v1957_v22  ;;  %v360_v22 = vrot.slane %v2459_v17, %v2455_v16 }
  0x24   :  { %277 = vmatprep.subr.bf16.mxu0 %v1958_v24 }
  0x25   :  { %573 = vmatpush1.bf16.msra.mxu1 %v2012_v45  ;;  %v2063_v45 = vld [vmem:[%s2824_s1 + $0x2c4] ss:$8 sps:$4 sm:$0xff]  }
  0x26   :  { %574 = vmatprep.subr.bf16.mxu1 %v2013_v47  ;;  %v2066_v47 = vld [vmem:[%s2824_s1 + $0x2d4] ss:$8 sps:$4 sm:$0xff]  }
  0x27   :  { %278 = vmatpush1.bf16.msra.mxu0 %v1960_v26 }
  0x28   :  { %279 = vmatprep.subr.bf16.mxu0 %v1961_v28 }
  0x29   :  { %575 = vmatpush1.bf16.msra.mxu1 %v2015_v49  ;;  %v2069_v49 = vld [vmem:[%s2824_s1 + $0x2e4] ss:$8 sps:$4 sm:$0xff]  }
  0x2a   :  { %576 = vmatprep.subr.bf16.mxu1 %v2016_v51  ;;  %v2072_v51 = vld [vmem:[%s2824_s1 + $0x2f4] ss:$8 sps:$4 sm:$0xff]  }
  0x2b   :  { %280 = vmatpush1.bf16.msra.mxu0 %v1963_v30 }
  0x2c   :  { %281 = vmatprep.subr.bf16.mxu0 %v1964_v32  ;;  %v2040_v32 = vld [vmem:[%s2824_s1 + $0x250] ss:$8 sps:$4 sm:$0xff]  }
  0x2d   :  { %577 = vmatpush1.bf16.msra.mxu1 %v2018_v54  ;;  %v2073_v54 = vld [vmem:[%s2824_s1 + $0x300] ss:$8 sps:$4 sm:$0xff]  }
  0x2e   :  { %578 = vmatprep.subr.bf16.mxu1 %v2019_v57  ;;  %v2081_v57 = vld [vmem:[%s2824_s1 + $0x324] ss:$8 sps:$4 sm:$0xff]  }
  0x2f   :  { %282 = vmatpush1.bf16.msra.mxu0 %v1966_v33  ;;  %v2045_v33 = vld [vmem:[%s2824_s1 + $0x264] ss:$8 sps:$4 sm:$0xff]  }
  0x30   :  { %283 = vmatprep.subr.bf16.mxu0 %v1967_v35  ;;  %v2048_v35 = vld [vmem:[%s2824_s1 + $0x274] ss:$8 sps:$4 sm:$0xff]  }
  0x31   :  { %579 = vmatpush1.bf16.msra.mxu1 %v2021_v58  ;;  %v2079_v58 = vld [vmem:[%s2824_s1 + $0x320] ss:$8 sps:$4 sm:$0xff]  }
  0x32   :  { %580 = vmatprep.subr.bf16.mxu1 %v2022_v60  ;;  %v2082_v60 = vld [vmem:[%s2824_s1 + $0x330] ss:$8 sps:$4 sm:$0xff]  }
  0x33   :  { %284 = vmatpush1.bf16.msra.mxu0 %v1969_v38  ;;  %v2049_v38 = vld [vmem:[%s2824_s1 + $0x280] ss:$8 sps:$4 sm:$0xff]  }
  0x34   :  { %285 = vmatprep.subr.bf16.mxu0 %v1970_v40  ;;  %v2052_v40 = vld [vmem:[%s2824_s1 + $0x290] ss:$8 sps:$4 sm:$0xff]  }
  0x35   :  { %581 = vmatpush1.bf16.msra.mxu1 %v2024_v62  ;;  %v2087_v62 = vld [vmem:[%s2824_s1 + $0x364] ss:$8 sps:$4 sm:$0xff]  }
  0x36   :  { %582 = vmatprep.subr.bf16.mxu1 %v2025_v63  ;;  %v2090_v63 = vld [vmem:[%s2824_s1 + $0x374] ss:$8 sps:$4 sm:$0xff]  }
  0x37   :  { %286 = vmatpush1.bf16.msra.mxu0 %v1972_v42  ;;  %v2055_v42 = vld [vmem:[%s2824_s1 + $0x2a0] ss:$8 sps:$4 sm:$0xff]  }
  0x38   :  { %287 = vmatprep.subr.bf16.mxu0 %v1973_v44  ;;  %v2058_v44 = vld [vmem:[%s2824_s1 + $0x2b0] ss:$8 sps:$4 sm:$0xff]  }
  0x39   :  { %583 = vmatpush1.bf16.msra.mxu1 %v2027_v1  ;;  %v2093_v1 = vld [vmem:[%s2824_s1 + $0x384] ss:$8 sps:$4 sm:$0xff]  }
  0x3a   :  { %584 = vmatprep.subr.bf16.mxu1 %v2028_v2  ;;  %v2091_v2 = vld [vmem:[%s2824_s1 + $0x380] ss:$8 sps:$4 sm:$0xff]  }
  0x3b   :  { %288 = vmatpush1.bf16.msra.mxu0 %v1975_v46  ;;  %v2061_v46 = vld [vmem:[%s2824_s1 + $0x2c0] ss:$8 sps:$4 sm:$0xff]  }
  0x3c   :  { %289 = vmatprep.subr.bf16.mxu0 %v1976_v48  ;;  %v2064_v48 = vld [vmem:[%s2824_s1 + $0x2d0] ss:$8 sps:$4 sm:$0xff]  }
  0x3d   :  { %585 = vmatpush1.bf16.msra.mxu1 %v2030_v3  ;;  %v2096_v3 = vld [vmem:[%s2824_s1 + $0x394] ss:$8 sps:$4 sm:$0xff]  }
  0x3e   :  { %586 = vmatprep.subr.bf16.mxu1 %v2031_v4  ;;  %v2094_v4 = vld [vmem:[%s2824_s1 + $0x390] ss:$8 sps:$4 sm:$0xff]  }
  0x3f   :  { %290 = vmatpush1.bf16.msra.mxu0 %v1978_v50  ;;  %v2067_v50 = vld [vmem:[%s2824_s1 + $0x2e0] ss:$8 sps:$4 sm:$0xff]  }
  0x40   :  { %302 = vmatprep.subr.bf16.mxu0 %v1985_v52  ;;  %v2070_v52 = vld [vmem:[%s2824_s1 + $0x2f0] ss:$8 sps:$4 sm:$0xff]  }
  0x41   :  { %587 = vmatpush1.bf16.msra.mxu1 %v2033_v5  ;;  %v2099_v5 = vld [vmem:[%s2824_s1 + $0x3a4] ss:$8 sps:$4 sm:$0xff]  }
  0x42   :  { %292 = vmatmul.mubr.bf16.vlgmr.msra.gmra.mrb[0].mxu0 %v1979_v53  ;;  %588 = vmatprep.subr.bf16.mxu1 %v2034_v6  ;;  %v2075_v53 = vld [vmem:[%s2824_s1 + $0x304] ss:$8 sps:$4 sm:$0xff]   ;;  %v2097_v6 = vld [vmem:[%s2824_s1 + $0x3a0] ss:$8 sps:$4 sm:$0xff]  }
  0x43   :  { %303 = vmatpush1.bf16.msra.mxu0 %v1983_v55  ;;  %334 = vmatprep.mubr.bf16.mxu0 %v2197_v61  ;;  %v2078_v55 = vld [vmem:[%s2824_s1 + $0x314] ss:$8 sps:$4 sm:$0xff]  }
  0x44   :  { %304 = vmatprep.subr.bf16.mxu0 %v1988_v56  ;;  %v2076_v56 = vld [vmem:[%s2824_s1 + $0x310] ss:$8 sps:$4 sm:$0xff]  }
  0x45   :  { %589 = vmatpush1.bf16.msra.mxu1 %v2036_v7  ;;  %v2102_v7 = vld [vmem:[%s2824_s1 + $0x3b4] ss:$8 sps:$4 sm:$0xff]  }
  0x46   :  { %816 = vmatprep.subr.bf16.mxu1 %v2039_v8  ;;  %v2100_v8 = vld [vmem:[%s2824_s1 + $0x3b0] ss:$8 sps:$4 sm:$0xff]  }
  0x47   :  { %305 = vmatpush1.bf16.msra.mxu0 %v1986_v59  ;;  %v2084_v59 = vld [vmem:[%s2824_s1 + $0x334] ss:$8 sps:$4 sm:$0xff]  }
  0x48   :  { %1068 = vmatprep.subr.bf16.mxu0 %v2087_v62  ;;  %v2148_v62 = vld [vmem:[%s2824_s1 + $0x4d0] ss:$8 sps:$4 sm:$0xff]  }
  0x4e   :  { %1599 = vmatmul.mubr.msk.bf16.vlgmr.msra.gmra.mrb[0].mxu0 %vm255_vm0, %v1982_v0  ;;  %v2088_v0 = vld [vmem:[%s2824_s1 + $0x370] ss:$8 sps:$4 sm:$0xff]  }
 0x121   :  { %v336_v18 = vpop.f32.mrb[0].mxu0 }
 0x122   :  { %v338_v19 = vpop.f32.mrb[1].mxu0 }
 0x123   :  { %v340_v21 = vpop.f32.mrb[2].mxu0 }
 0x124   :  { %v345_v23 = vpack.c.bf16 %v340_v21, %v336_v18  ;;  %v342_v24 = vpop.f32.mrb[3].mxu0  ;;  %v2108_v18 = vld [vmem:[%s2824_s1 + $0x3d4] ss:$8 sps:$4 sm:$0xff]   ;;  %v2109_v21 = vld [vmem:[%s2824_s1 + $0x3e0] ss:$8 sps:$4 sm:$0xff]  }
 0x125   :  { %v346_v25 = vpack.c.bf16 %v342_v24, %v338_v19  ;;  %v2106_v19 = vld [vmem:[%s2824_s1 + $0x3d0] ss:$8 sps:$4 sm:$0xff]   ;;  %v2117_v24 = vld [vmem:[%s2824_s1 + $0x404] ss:$8 sps:$4 sm:$0xff]  }
 0x126   :  { %v361_v26 = vadd.bf16 %v353_v20, %v345_v23  ;;  %v2111_v20 = vld [vmem:[%s2824_s1 + $0x3e4] ss:$8 sps:$4 sm:$0xff]   ;;  %v2112_v23 = vld [vmem:[%s2824_s1 + $0x3f0] ss:$8 sps:$4 sm:$0xff]  }
 0x127   :  { %v362_v27 = vadd.bf16 %v360_v22, %v346_v25  ;;  %v2114_v22 = vld [vmem:[%s2824_s1 + $0x3f4] ss:$8 sps:$4 sm:$0xff]   ;;  %v2115_v25 = vld [vmem:[%s2824_s1 + $0x400] ss:$8 sps:$4 sm:$0xff]  }
 0x128   :  { %v363_v30 = vmax.bf16 %v2197_v61, %v361_v26  ;;  %v2120_v26 = vld [vmem:[%s2824_s1 + $0x414] ss:$8 sps:$4 sm:$0xff]  }
 0x129   :  { %v364_v28 = vmax.bf16 %v2197_v61, %v362_v27  ;;  %v2085_v61 = vld [vmem:[%s2824_s1 + $0x360] ss:$8 sps:$4 sm:$0xff]   ;;  %v2118_v27 = vld [vmem:[%s2824_s1 + $0x410] ss:$8 sps:$4 sm:$0xff]  }
 0x12a   :  { %1069 = vmatpush1.bf16.msra.mxu0 %v2085_v61  ;;  %v2150_v61 = vld [vmem:[%s2824_s1 + $0x4d4] ss:$8 sps:$4 sm:$0xff]  }
 0x12b   :  { %590 = vmatprep.mubr.bf16.mxu1 %v364_v28  ;;  %1070 = vmatprep.subr.bf16.mxu0 %v2090_v63  ;;  %v2123_v28 = vld [vmem:[%s2824_s1 + $0x424] ss:$8 sps:$4 sm:$0xff]  }
 0x12c   :  { %591 = vmatmul.mubr.bf16.vlgmr.msra.gmra.mrb[0].mxu1 %v363_v30  ;;  %v603_v30 = vshrl.u32 %v2444_v12, 16  ;;  %v2153_v63 = vld [vmem:[%s2824_s1 + $0x4e4] ss:$8 sps:$4 sm:$0xff]  }
 0x12d   :  { %817 = vmatpush1.bf16.msra.mxu1 %v2037_v29  ;;  %v2121_v29 = vld [vmem:[%s2824_s1 + $0x420] ss:$8 sps:$4 sm:$0xff]  }
 0x12e   :  { %818 = vmatprep.subr.bf16.mxu1 %v2042_v31  ;;  %1071 = vmatpush1.bf16.msra.mxu0 %v2088_v0  ;;  %v610_v31 = vshrl.u32 %v2448_v14, 16  ;;  %v2151_v0 = vld [vmem:[%s2824_s1 + $0x4e0] ss:$8 sps:$4 sm:$0xff]  }
 0x12f   :  { %1072 = vmatprep.subr.bf16.mxu0 %v2093_v1  ;;  %v2156_v1 = vld [vmem:[%s2824_s1 + $0x4f4] ss:$8 sps:$4 sm:$0xff]  }
 0x131   :  { %819 = vmatpush1.bf16.msra.mxu1 %v2040_v32  ;;  %v2638_v32 = vpack.i.b16 %v603_v30, %v603_v30 }
 0x132   :  { %820 = vmatprep.subr.bf16.mxu1 %v2045_v33  ;;  %1073 = vmatpush1.bf16.msra.mxu0 %v2091_v2  ;;  %v2640_v33 = vpack.i.b16 %v610_v31, %v610_v31  ;;  %v2154_v2 = vld [vmem:[%s2824_s1 + $0x4f0] ss:$8 sps:$4 sm:$0xff]  }
 0x133   :  { %1074 = vmatprep.subr.bf16.mxu0 %v2096_v3  ;;  %v2159_v3 = vld [vmem:[%s2824_s1 + $0x504] ss:$8 sps:$4 sm:$0xff]  }
 0x135   :  { %821 = vmatpush1.bf16.msra.mxu1 %v2043_v34 }
 0x136   :  { %822 = vmatprep.subr.bf16.mxu1 %v2048_v35  ;;  %1075 = vmatpush1.bf16.msra.mxu0 %v2094_v4  ;;  %v2157_v4 = vld [vmem:[%s2824_s1 + $0x500] ss:$8 sps:$4 sm:$0xff]  }
 0x137   :  { %1076 = vmatprep.subr.bf16.mxu0 %v2099_v5  ;;  %v2162_v5 = vld [vmem:[%s2824_s1 + $0x514] ss:$8 sps:$4 sm:$0xff]  }
 0x139   :  { %823 = vmatpush1.bf16.msra.mxu1 %v2046_v36  ;;  %v609_v36 = vrot.slane %v2638_v32, %v2455_v16 }
 0x13a   :  { %824 = vmatprep.subr.bf16.mxu1 %v2051_v37  ;;  %1077 = vmatpush1.bf16.msra.mxu0 %v2097_v6  ;;  %v2160_v6 = vld [vmem:[%s2824_s1 + $0x510] ss:$8 sps:$4 sm:$0xff]  }
 0x13b   :  { %1078 = vmatprep.subr.bf16.mxu0 %v2102_v7  ;;  %v2165_v7 = vld [vmem:[%s2824_s1 + $0x524] ss:$8 sps:$4 sm:$0xff]  }
 0x13d   :  { %825 = vmatpush1.bf16.msra.mxu1 %v2049_v38  ;;  %v616_v38 = vrot.slane %v2640_v33, %v2455_v16  ;;  %v2129_v16 = vld [vmem:[%s2824_s1 + $0x444] ss:$8 sps:$4 sm:$0xff]  }
 0x13e   :  { %826 = vmatprep.subr.bf16.mxu1 %v2054_v39  ;;  %1079 = vmatpush1.bf16.msra.mxu0 %v2100_v8  ;;  %v2163_v8 = vld [vmem:[%s2824_s1 + $0x520] ss:$8 sps:$4 sm:$0xff]  }
 0x13f   :  { %1080 = vmatprep.subr.bf16.mxu0 %v2105_v9  ;;  %v2168_v9 = vld [vmem:[%s2824_s1 + $0x534] ss:$8 sps:$4 sm:$0xff]  }
 0x141   :  { %827 = vmatpush1.bf16.msra.mxu1 %v2052_v40 }
 0x142   :  { %828 = vmatprep.subr.bf16.mxu1 %v2057_v41  ;;  %1081 = vmatpush1.bf16.msra.mxu0 %v2103_v11  ;;  %v2166_v11 = vld [vmem:[%s2824_s1 + $0x530] ss:$8 sps:$4 sm:$0xff]  }
 0x143   :  { %1082 = vmatprep.subr.bf16.mxu0 %v2108_v18  ;;  %v2171_v18 = vld [vmem:[%s2824_s1 + $0x544] ss:$8 sps:$4 sm:$0xff]  }
 0x145   :  { %829 = vmatpush1.bf16.msra.mxu1 %v2055_v42 }
 0x146   :  { %830 = vmatprep.subr.bf16.mxu1 %v2060_v43  ;;  %1083 = vmatpush1.bf16.msra.mxu0 %v2106_v19  ;;  %v2169_v19 = vld [vmem:[%s2824_s1 + $0x540] ss:$8 sps:$4 sm:$0xff]  }
 0x147   :  { %1084 = vmatprep.subr.bf16.mxu0 %v2111_v20  ;;  %v863_v20 = vsub.s32 1, %v2446_v13 }
 0x149   :  { %831 = vmatpush1.bf16.msra.mxu1 %v2058_v44 }
 0x14a   :  { %832 = vmatprep.subr.bf16.mxu1 %v2063_v45  ;;  %1085 = vmatpush1.bf16.msra.mxu0 %v2109_v21 }
 0x14b   :  { %1086 = vmatprep.subr.bf16.mxu0 %v2114_v22 }
 0x14d   :  { %833 = vmatpush1.bf16.msra.mxu1 %v2061_v46  ;;  %v2126_v46 = vld [vmem:[%s2824_s1 + $0x434] ss:$8 sps:$4 sm:$0xff]  }
 0x14e   :  { %834 = vmatprep.subr.bf16.mxu1 %v2066_v47  ;;  %1087 = vmatpush1.bf16.msra.mxu0 %v2112_v23  ;;  %v2124_v47 = vld [vmem:[%s2824_s1 + $0x430] ss:$8 sps:$4 sm:$0xff]   ;;  %v864_v23 = vrot.slane %v2452_v15, %v863_v20 }
 0x14f   :  { %1088 = vmatprep.subr.bf16.mxu0 %v2117_v24 }
 0x151   :  { %835 = vmatpush1.bf16.msra.mxu1 %v2064_v48  ;;  %v2127_v48 = vld [vmem:[%s2824_s1 + $0x440] ss:$8 sps:$4 sm:$0xff]  }
 0x152   :  { %836 = vmatprep.subr.bf16.mxu1 %v2069_v49  ;;  %1089 = vmatpush1.bf16.msra.mxu0 %v2115_v25  ;;  %v2132_v49 = vld [vmem:[%s2824_s1 + $0x454] ss:$8 sps:$4 sm:$0xff]   ;;  %v868_v25 = vrot.slane %v2459_v17, %v863_v20 }
 0x153   :  { %1090 = vmatprep.subr.bf16.mxu0 %v2120_v26 }
 0x155   :  { %837 = vmatpush1.bf16.msra.mxu1 %v2067_v50  ;;  %v2130_v50 = vld [vmem:[%s2824_s1 + $0x450] ss:$8 sps:$4 sm:$0xff]  }
 0x156   :  { %838 = vmatprep.subr.bf16.mxu1 %v2072_v51  ;;  %1091 = vmatpush1.bf16.msra.mxu0 %v2118_v27  ;;  %v2133_v51 = vld [vmem:[%s2824_s1 + $0x480] ss:$8 sps:$4 sm:$0xff]  }
 0x157   :  { %1092 = vmatprep.subr.bf16.mxu0 %v2123_v28 }
 0x159   :  { %839 = vmatpush1.bf16.msra.mxu1 %v2070_v52  ;;  %v2135_v52 = vld [vmem:[%s2824_s1 + $0x484] ss:$8 sps:$4 sm:$0xff]  }
 0x15a   :  { %840 = vmatprep.subr.bf16.mxu1 %v2075_v53  ;;  %1093 = vmatpush1.bf16.msra.mxu0 %v2121_v29  ;;  %v2138_v53 = vld [vmem:[%s2824_s1 + $0x494] ss:$8 sps:$4 sm:$0xff]  }
 0x15b   :  { %1094 = vmatprep.subr.bf16.mxu0 %v2126_v46  ;;  %v2186_v46 = vld [vmem:[%s2824_s1 + $0x5c0] ss:$8 sps:$4 sm:$0xff]  }
 0x15d   :  { %841 = vmatpush1.bf16.msra.mxu1 %v2073_v54  ;;  %v2136_v54 = vld [vmem:[%s2824_s1 + $0x490] ss:$8 sps:$4 sm:$0xff]  }
 0x15e   :  { %842 = vmatprep.subr.bf16.mxu1 %v2078_v55  ;;  %1095 = vmatpush1.bf16.msra.mxu0 %v2124_v47  ;;  %v2141_v55 = vld [vmem:[%s2824_s1 + $0x4a4] ss:$8 sps:$4 sm:$0xff]   ;;  %v2187_v47 = vld [vmem:[%s2824_s1 + $0x650] ss:$8 sps:$4 sm:$0xff]  }
 0x15f   :  { %1096 = vmatprep.subr.bf16.mxu0 %v2129_v16  ;;  %v2188_v16 = vld [vmem:[%s2824_s1 + $0x5d0] ss:$8 sps:$4 sm:$0xff]  }
 0x161   :  { %843 = vmatpush1.bf16.msra.mxu1 %v2076_v56  ;;  %v2139_v56 = vld [vmem:[%s2824_s1 + $0x4a0] ss:$8 sps:$4 sm:$0xff]  }
 0x162   :  { %844 = vmatprep.subr.bf16.mxu1 %v2081_v57  ;;  %1097 = vmatpush1.bf16.msra.mxu0 %v2127_v48  ;;  %v2144_v57 = vld [vmem:[%s2824_s1 + $0x4b4] ss:$8 sps:$4 sm:$0xff]   ;;  %v2189_v48 = vld [vmem:[%s2824_s1 + $0x660] ss:$8 sps:$4 sm:$0xff]  }
 0x163   :  { %1098 = vmatprep.subr.bf16.mxu0 %v2132_v49  ;;  %v2190_v49 = vld [vmem:[%s2824_s1 + $0x5e0] ss:$8 sps:$4 sm:$0xff]  }
 0x165   :  { %845 = vmatpush1.bf16.msra.mxu1 %v2079_v58  ;;  %v2142_v58 = vld [vmem:[%s2824_s1 + $0x4b0] ss:$8 sps:$4 sm:$0xff]  }
 0x166   :  { %846 = vmatprep.subr.bf16.mxu1 %v2084_v59  ;;  %1099 = vmatpush1.bf16.msra.mxu0 %v2130_v50  ;;  %v2147_v59 = vld [vmem:[%s2824_s1 + $0x4c4] ss:$8 sps:$4 sm:$0xff]  }
 0x169   :  { %847 = vmatpush1.bf16.msra.mxu1 %v2082_v60  ;;  %v2145_v60 = vld [vmem:[%s2824_s1 + $0x4c0] ss:$8 sps:$4 sm:$0xff]  }
 0x16a   :  { %1320 = vmatprep.subr.bf16.mxu1 %v2135_v52  ;;  %v1116_v52 = vrot.slane %v2638_v32, %v863_v20  ;;  %v2192_v32 = vld [vmem:[%s2824_s1 + $0x5f0] ss:$8 sps:$4 sm:$0xff]  }
 0x1ff   :  { %v592_v34 = vpop.f32.mrb[0].mxu1 }
 0x200   :  { %v594_v35 = vpop.f32.mrb[1].mxu1 }
 0x201   :  { %v596_v37 = vpop.f32.mrb[2].mxu1 }
 0x202   :  { %v601_v39 = vpack.c.bf16 %v596_v37, %v592_v34  ;;  %v598_v40 = vpop.f32.mrb[3].mxu1  ;;  %v2174_v37 = vld [vmem:[%s2824_s1 + $0x554] ss:$8 sps:$4 sm:$0xff]  }
 0x203   :  { %v602_v41 = vpack.c.bf16 %v598_v40, %v594_v35  ;;  %v2175_v40 = vld [vmem:[%s2824_s1 + $0x560] ss:$8 sps:$4 sm:$0xff]  }
 0x204   :  { %v617_v42 = vadd.bf16 %v609_v36, %v601_v39  ;;  %v2177_v39 = vld [vmem:[%s2824_s1 + $0x564] ss:$8 sps:$4 sm:$0xff]  }
 0x205   :  { %v618_v12 = vadd.bf16 %v616_v38, %v602_v41  ;;  %v2172_v38 = vld [vmem:[%s2824_s1 + $0x550] ss:$8 sps:$4 sm:$0xff]   ;;  %v2180_v41 = vld [vmem:[%s2824_s1 + $0x574] ss:$8 sps:$4 sm:$0xff]  }
 0x206   :  { %v619_v43 = vmul.bf16 1009007652, %v617_v42 }
 0x207   :  { %v620_v14 = vmul.bf16 1009007652, %v618_v12 }
 0x208   :  { %v621_v45 = vmax.bf16 %v619_v43, %v617_v42  ;;  %v2178_v42 = vld [vmem:[%s2824_s1 + $0x570] ss:$8 sps:$4 sm:$0xff]   ;;  %v2182_v43 = vld [vmem:[%s2824_s1 + $0x5a0] ss:$8 sps:$4 sm:$0xff]  }
 0x209   :  { %v622_v44 = vmax.bf16 %v620_v14, %v618_v12  ;;  %v2181_v12 = vld [vmem:[%s2824_s1 + $0x620] ss:$8 sps:$4 sm:$0xff]   ;;  %v2183_v14 = vld [vmem:[%s2824_s1 + $0x630] ss:$8 sps:$4 sm:$0xff]  }
 0x20a   :  { %1904 = vmatprep.subr.bf16.mxu0 %v2181_v12 }
 0x20b   :  { %848 = vmatprep.mubr.bf16.mxu1 %v622_v44  ;;  %v2184_v44 = vld [vmem:[%s2824_s1 + $0x5b0] ss:$8 sps:$4 sm:$0xff]  }
 0x20c   :  { %849 = vmatmul.mubr.bf16.vlgmr.msra.gmra.mrb[4].mxu1 %v621_v45  ;;  %v2185_v45 = vld [vmem:[%s2824_s1 + $0x640] ss:$8 sps:$4 sm:$0xff]  }
 0x20d   :  { %1321 = vmatpush1.bf16.msra.mxu1 %v2133_v51 }
 0x20e   :  { %1322 = vmatprep.subr.bf16.mxu1 %v2138_v53 }
 0x211   :  { %1323 = vmatpush1.bf16.msra.mxu1 %v2136_v54  ;;  %v1120_v54 = vrot.slane %v2640_v33, %v863_v20  ;;  %v2193_v33 = vld [vmem:[%s2824_s1 + $0x680] ss:$8 sps:$4 sm:$0xff]  }
 0x212   :  { %1324 = vmatprep.subr.bf16.mxu1 %v2141_v55 }
 0x215   :  { %1325 = vmatpush1.bf16.msra.mxu1 %v2139_v56 }
 0x216   :  { %1326 = vmatprep.subr.bf16.mxu1 %v2144_v57 }
 0x219   :  { %1327 = vmatpush1.bf16.msra.mxu1 %v2142_v58 }
 0x21a   :  { %1328 = vmatprep.subr.bf16.mxu1 %v2147_v59 }
 0x21d   :  { %1329 = vmatpush1.bf16.msra.mxu1 %v2145_v60 }
 0x21e   :  { %1330 = vmatprep.subr.bf16.mxu1 %v2150_v61 }
 0x221   :  { %1331 = vmatpush1.bf16.msra.mxu1 %v2148_v62 }
 0x222   :  { %1332 = vmatprep.subr.bf16.mxu1 %v2153_v63 }
 0x225   :  { %1333 = vmatpush1.bf16.msra.mxu1 %v2151_v0  ;;  %v2191_v0 = vld [vmem:[%s2824_s1 + $0x670] ss:$8 sps:$4 sm:$0xff]  }
 0x226   :  { %1334 = vmatprep.subr.bf16.mxu1 %v2156_v1  ;;  %v2194_v1 = vld [vmem:[%s2824_s1 + $0x600] ss:$8 sps:$4 sm:$0xff]  }
 0x229   :  { %1335 = vmatpush1.bf16.msra.mxu1 %v2154_v2  ;;  %v2195_v2 = vld [vmem:[%s2824_s1 + $0x690] ss:$8 sps:$4 sm:$0xff]  }
 0x22a   :  { %1336 = vmatprep.subr.bf16.mxu1 %v2159_v3  ;;  %v2196_v3 = vld [vmem:[%s2824_s1 + $0x610] ss:$8 sps:$4 sm:$0xff]  }
 0x22d   :  { %1337 = vmatpush1.bf16.msra.mxu1 %v2157_v4  ;;  %v1367_v4 = vsub.s32 2, %v2446_v13 }
 0x22e   :  { %1338 = vmatprep.subr.bf16.mxu1 %v2162_v5 }
 0x231   :  { %1339 = vmatpush1.bf16.msra.mxu1 %v2160_v6 }
 0x232   :  { %1340 = vmatprep.subr.bf16.mxu1 %v2165_v7  ;;  %v1368_v7 = vrot.slane %v2452_v15, %v1367_v4 }
 0x235   :  { %1341 = vmatpush1.bf16.msra.mxu1 %v2163_v8 }
 0x236   :  { %1342 = vmatprep.subr.bf16.mxu1 %v2168_v9  ;;  %v1372_v9 = vrot.slane %v2459_v17, %v1367_v4 }
 0x239   :  { %1343 = vmatpush1.bf16.msra.mxu1 %v2166_v11 }
 0x23a   :  { %1344 = vmatprep.subr.bf16.mxu1 %v2171_v18 }
 0x23d   :  { %1345 = vmatpush1.bf16.msra.mxu1 %v2169_v19 }
 0x23e   :  { %1346 = vmatprep.subr.bf16.mxu1 %v2174_v37 }
 0x241   :  { %1347 = vmatpush1.bf16.msra.mxu1 %v2172_v38 }
 0x242   :  { %1348 = vmatprep.subr.bf16.mxu1 %v2177_v39 }
 0x245   :  { %1349 = vmatpush1.bf16.msra.mxu1 %v2175_v40 }
 0x246   :  { %1350 = vmatprep.subr.bf16.mxu1 %v2180_v41 }
 0x249   :  { %1351 = vmatpush1.bf16.msra.mxu1 %v2178_v42 }
 0x2df   :  { %v850_v21 = vpop.f32.mrb[4].mxu1 }
 0x2e0   :  { %v852_v22 = vpop.f32.mrb[5].mxu1 }
 0x2e1   :  { %v854_v24 = vpop.f32.mrb[6].mxu1 }
 0x2e2   :  { %v859_v26 = vpack.c.bf16 %v854_v24, %v850_v21  ;;  %v856_v27 = vpop.f32.mrb[7].mxu1 }
 0x2e3   :  { %v860_v28 = vpack.c.bf16 %v856_v27, %v852_v22 }
 0x2e4   :  { %v869_v29 = vadd.bf16 %v864_v23, %v859_v26  ;;  %v1414_v26 = vsub.s32 5, %v2446_v13 }
 0x2e5   :  { %v870_v30 = vadd.bf16 %v868_v25, %v860_v28 }
 0x2e6   :  { %v871_v31 = vmul.bf16 1009007652, %v869_v29  ;;  %v1415_v28 = vrot.slane %v2437_v10, %v1414_v26 }
 0x2e7   :  { %v872_v34 = vmul.bf16 1009007652, %v870_v30 }
 0x2e8   :  { %v873_v36 = vmax.bf16 %v871_v31, %v869_v29 }
 0x2e9   :  { %v874_v35 = vmax.bf16 %v872_v34, %v870_v30 }
 0x2eb   :  { %1100 = vmatprep.mubr.bf16.mxu0 %v874_v35 }
 0x2ec   :  { %1101 = vmatmul.mubr.bf16.vlgmr.msra.gmra.mrb[4].mxu0 %v873_v36 }
 0x2ed   :  { %1905 = vmatpush3.bf16.msra.mxu0 %v2182_v43 }
 0x2ee   :  { %1906 = vmatprep.subr.bf16.mxu0 %v2183_v14 }
 0x2f1   :  { %1907 = vmatpush3.bf16.msra.mxu0 %v2184_v44 }
 0x2f2   :  { %1908 = vmatprep.subr.bf16.mxu0 %v2185_v45 }
 0x2f5   :  { %1909 = vmatpush3.bf16.msra.mxu0 %v2186_v46 }
 0x2f6   :  { %1910 = vmatprep.subr.bf16.mxu0 %v2187_v47 }
 0x2f9   :  { %1911 = vmatpush3.bf16.msra.mxu0 %v2188_v16 }
 0x2fa   :  { %1912 = vmatprep.subr.bf16.mxu0 %v2189_v48 }
 0x2fd   :  { %1913 = vmatpush3.bf16.msra.mxu0 %v2190_v49 }
 0x2fe   :  { %1914 = vmatprep.subr.bf16.mxu0 %v2191_v0 }
 0x301   :  { %1915 = vmatpush3.bf16.msra.mxu0 %v2192_v32 }
 0x302   :  { %1916 = vmatprep.subr.bf16.mxu0 %v2193_v33 }
 0x305   :  { %1917 = vmatpush3.bf16.msra.mxu0 %v2194_v1 }
 0x306   :  { %1918 = vmatprep.subr.bf16.mxu0 %v2195_v2 }
 0x309   :  { %1919 = vmatpush3.bf16.msra.mxu0 %v2196_v3 }
 0x3bf   :  { %v1102_v50 = vpop.f32.mrb[4].mxu0 }
 0x3c0   :  { %v1104_v51 = vpop.f32.mrb[5].mxu0 }
 0x3c1   :  { %v1106_v53 = vpop.f32.mrb[6].mxu0 }
 0x3c2   :  { %v1111_v55 = vpack.c.bf16 %v1106_v53, %v1102_v50  ;;  %v1108_v56 = vpop.f32.mrb[7].mxu0 }
 0x3c3   :  { %v1112_v57 = vpack.c.bf16 %v1108_v56, %v1104_v51 }
 0x3c4   :  { %v1121_v58 = vadd.bf16 %v1116_v52, %v1111_v55 }
 0x3c5   :  { %v1122_v59 = vadd.bf16 %v1120_v54, %v1112_v57 }
 0x3c6   :  { %v1123_v60 = vmul.bf16 1009007652, %v1121_v58 }
 0x3c7   :  { %v1124_v61 = vmul.bf16 1009007652, %v1122_v59 }
 0x3c8   :  { %v1125_v63 = vmax.bf16 %v1123_v60, %v1121_v58 }
 0x3c9   :  { %v1126_v62 = vmax.bf16 %v1124_v61, %v1122_v59 }
 0x3cb   :  { %1352 = vmatprep.mubr.bf16.mxu1 %v1126_v62 }
 0x3cc   :  { %1353 = vmatmul.mubr.bf16.vlgmr.msra.gmra.mrb[8].mxu1 %v1125_v63 }
 0x49f   :  { %v1354_v5 = vpop.f32.mrb[8].mxu1 }
 0x4a0   :  { %v1356_v6 = vpop.f32.mrb[9].mxu1 }
 0x4a1   :  { %v1358_v8 = vpop.f32.mrb[10].mxu1 }
 0x4a2   :  { %v1363_v11 = vpack.c.bf16 %v1358_v8, %v1354_v5  ;;  %v1360_v18 = vpop.f32.mrb[11].mxu1 }
 0x4a3   :  { %v1364_v19 = vpack.c.bf16 %v1360_v18, %v1356_v6 }
 0x4a4   :  { %v1373_v20 = vadd.bf16 %v1368_v7, %v1363_v11 }
 0x4a5   :  { %v1374_v21 = vadd.bf16 %v1372_v9, %v1364_v19 }
 0x4a6   :  { %v1375_v22 = vmul.bf16 1009007652, %v1373_v20 }
 0x4a7   :  { %v1376_v23 = vmul.bf16 1009007652, %v1374_v21 }
 0x4a8   :  { %v1377_v25 = vmax.bf16 %v1375_v22, %v1373_v20 }
 0x4a9   :  { %v1378_v24 = vmax.bf16 %v1376_v23, %v1374_v21 }
 0x4ab   :  { %1544 = vmatprep.mubr.bf16.mxu0 %v1378_v24 }
 0x4ac   :  { %1545 = vmatmul.mubr.bf16.vlgmr.msra.gmra.mrb[8].mxu0 %v1377_v25 }
 0x57f   :  { %v1920_v27 = vpop.f32.mrb[8].mxu0 }
 0x580   :  { %v1921_v15 = vpop.f32.mrb[9].mxu0 }
 0x581   :  { %v1922_v29 = vadd.f32 %v1921_v15, %v1920_v27  ;;  %v1923_v30 = vpop.f32.mrb[10].mxu0 }
 0x582   :  { %v1924_v17 = vpop.f32.mrb[11].mxu0 }
 0x583   :  { %v1547_v31 = vadd.f32 %v1922_v29, %v1415_v28  ;;  %v1925_v34 = vadd.f32 %v1924_v17, %v1923_v30 }
 0x585   :  { %1554 = vst.msk [vmem:[%s2827_s3] sm:$0xff] %vm1553_vm1, %v1547_v31  ;;  %v1550_v35 = vadd.f32 %v1925_v34, %v1415_v28 }
 0x587   :  { %1555 = vst.msk [vmem:[%s2827_s3 + $0x8] sm:$0xff] %vm1553_vm1, %v1550_v35 }

</bundles_post_ra>
